<compile_context>
chip_gen: v5e
topology: v5e:2x2
jax: 0.10.0
libtpu: 0.0.40
codegen_flags: <defaults>
</compile_context>

<pallas_src>
import jax
import jax.numpy as jnp
from jax.experimental import pallas as pl
from jax.experimental.pallas import tpu as pltpu

HIDDEN = 64          # real hidden width of the PyTorch module
H_PAD = 128          # hidden padded to full lane width
F_PAD = 8            # input feature dim padded to a sublane multiple

# Packed parameter slab layout (all sections start on 8-row boundaries).
_W1_ROW = 0          # rows [0, 8)      : W1 padded          [F_PAD, H_PAD]
_W2_ROW = 8          # rows [8, 136)    : W2 padded          [H_PAD, H_PAD]
_W3_ROW = 136        # rows [136, 264)  : w3 replicated      [H_PAD, H_PAD]
_B1_ROW = 264        # row  264         : b1 padded          [1, H_PAD]
_B2_ROW = 272        # row  272         : b2 padded          [1, H_PAD]
_B3_ROW = 280        # row  280         : b3 in all 128 lanes[1, H_PAD]
SLAB_ROWS = 288      # multiple of 8  (288 * 128 * 4 B ~= 147 KiB)


def critic_kernel(x_ref, p_ref, o_ref):
    x = x_ref[...]                                       # [Bt, F_PAD]
    w1 = p_ref[_W1_ROW:_W1_ROW + F_PAD, :]               # [F_PAD, H_PAD]
    w2 = p_ref[_W2_ROW:_W2_ROW + H_PAD, :]               # [H_PAD, H_PAD]
    w3 = p_ref[_W3_ROW:_W3_ROW + H_PAD, :]               # [H_PAD, H_PAD] (cols identical)
    b1 = p_ref[_B1_ROW:_B1_ROW + 1, :]                   # [1, H_PAD]
    b2 = p_ref[_B2_ROW:_B2_ROW + 1, :]                   # [1, H_PAD]
    b3 = p_ref[_B3_ROW:_B3_ROW + 1, :]                   # [1, H_PAD] (b3 in all lanes)

    # fc1 + tanh   (padded hidden cols stay exactly 0 through tanh(0))
    h1 = jnp.tanh(jnp.dot(x, w1, preferred_element_type=jnp.float32) + b1)
    # fc2 + tanh
    h2 = jnp.tanh(jnp.dot(h1, w2, preferred_element_type=jnp.float32) + b2)
    # fc3 on the MXU: w3 is replicated across all 128 columns, so every lane of
    # the result holds the critic value -> full-lane unmasked store, no XLU
    # reduction, no broadcast.  Column 0 is extracted outside the kernel.
    v = jnp.dot(h2, w3, preferred_element_type=jnp.float32) + b3   # [Bt, H_PAD]
    o_ref[...] = v.astype(o_ref.dtype)


def pack_params(w1, b1, w2, b2, w3, b3):
    """Pack (w1[state,64], b1[64], w2[64,64], b2[64], w3[64,1], b3[1]) into one
    lane-padded [SLAB_ROWS, 128] float32 slab (single DMA, resident in VMEM)."""
    state = w1.shape[0]
    assert state <= F_PAD, "pad layout assumes state_space <= 8"
    slab = jnp.zeros((SLAB_ROWS, H_PAD), jnp.float32)
    slab = slab.at[_W1_ROW:_W1_ROW + state, 0:HIDDEN].set(w1.astype(jnp.float32))
    slab = slab.at[_W2_ROW:_W2_ROW + HIDDEN, 0:HIDDEN].set(w2.astype(jnp.float32))
    # w3 column replicated into all 128 output columns (padded rows stay 0).
    w3_rep = jnp.tile(w3.reshape(HIDDEN, 1).astype(jnp.float32), (1, H_PAD))
    slab = slab.at[_W3_ROW:_W3_ROW + HIDDEN, :].set(w3_rep)
    slab = slab.at[_B1_ROW, 0:HIDDEN].set(b1.reshape(-1).astype(jnp.float32))
    slab = slab.at[_B2_ROW, 0:HIDDEN].set(b2.reshape(-1).astype(jnp.float32))
    slab = slab.at[_B3_ROW, :].set(jnp.full((H_PAD,), jnp.float32(b3.reshape(-1)[0])))
    return slab


def critic_forward(x, slab, *, block_b=256):
    """x: [B, state_space] f32, slab: packed params -> [B, 1] f32."""
    B, F = x.shape
    assert F <= F_PAD

    # Batch tile: 256 rows for large batches, else smallest multiple of 8 >= B.
    if B >= block_b:
        bt = block_b
    else:
        bt = max(8, ((B + 7) // 8) * 8)
    b_pad = pl.cdiv(B, bt) * bt

    # Pad batch + features with zeros (padded rows discarded after the call).
    x_p = jnp.zeros((b_pad, F_PAD), jnp.float32).at[:B, :F].set(x)

    out = pl.pallas_call(
        critic_kernel,
        out_shape=jax.ShapeDtypeStruct((b_pad, H_PAD), jnp.float32),
        grid=(b_pad // bt,),
        in_specs=[
            pl.BlockSpec((bt, F_PAD), lambda i: (i, 0)),          # batch tile
            pl.BlockSpec((SLAB_ROWS, H_PAD), lambda i: (0, 0)),   # resident weights
        ],
        out_specs=pl.BlockSpec((bt, H_PAD), lambda i: (i, 0)),
        compiler_params=pltpu.CompilerParams(
            dimension_semantics=("parallel",)),
    )(x_p, slab)

    # Every lane of a row holds the same critic value; take column 0.
    return out[:B, 0:1]


def init_params(key, state_space, hidden=HIDDEN):
    """Matches Critic.init_weights: weight ~ N(0,1), bias = 0.
    Weights stored as [in, out] (transposed w.r.t. PyTorch's [out, in])."""
    k1, k2, k3 = jax.random.split(key, 3)
    w1 = jax.random.normal(k1, (state_space, hidden), jnp.float32)
    b1 = jnp.zeros((hidden,), jnp.float32)
    w2 = jax.random.normal(k2, (hidden, hidden), jnp.float32)
    b2 = jnp.zeros((hidden,), jnp.float32)
    w3 = jax.random.normal(k3, (hidden, 1), jnp.float32)
    b3 = jnp.zeros((1,), jnp.float32)
    return (w1, b1, w2, b2, w3, b3)


if __name__ == "__main__":
    key = jax.random.PRNGKey(0)
    k_x, k_p = jax.random.split(key)

    batch = 2
    state_space = 4      # CartPole observation dimension
    action_space = 2     # unused by Critic forward

    x = jax.random.normal(k_x, (batch, state_space), jnp.float32)
    w1, b1, w2, b2, w3, b3 = init_params(k_p, state_space)
    slab = pack_params(w1, b1, w2, b2, w3, b3)   # done once, reused every step

    out = jax.jit(critic_forward)(x, slab)
    out = jax.block_until_ready(out)

    # Pure-JAX reference check
    ref = jnp.tanh(x @ w1 + b1)
    ref = jnp.tanh(ref @ w2 + b2)
    ref = ref @ w3 + b3
    assert out.shape == (batch, 1)
    assert jnp.allclose(out, ref, atol=1e-5, rtol=1e-5)

    # TODO(synk): for the RL inner loop, fuse actor + critic forwards into one
    # pallas_call (shared parameter slab) to drop one launch + weight DMA per step.
    print("KERNEL_OK")
</pallas_src>

<mosaic_0001>
module attributes {stable_mosaic.version = 11 : i64} {
  func.func @critic_kernel(%arg0: i32, %arg1: memref<8x8xf32, #tpu.memory_space<vmem>>, %arg2: memref<288x128xf32, #tpu.memory_space<vmem>>, %arg3: memref<8x128xf32, #tpu.memory_space<vmem>>) attributes {dimension_semantics = [#tpu.dimension_semantics<parallel>], iteration_bounds = array<i64: 1>, scalar_prefetch = 0 : i64, scratch_operands = 0 : i64, tpu.core_type = #tpu.core_type<tc>, window_params = [{transform_indices = @transform_0, window_bounds = array<i64: 8, 8>}, {pipeline_mode = #tpu.pipeline_mode<synchronous>, transform_indices = @transform_1, window_bounds = array<i64: 288, 128>}, {transform_indices = @transform_2, window_bounds = array<i64: 8, 128>}]} {
    %c0 = arith.constant 0 : index
    %c0_0 = arith.constant 0 : index
    %0 = vector.load %arg1[%c0, %c0_0] : memref<8x8xf32, #tpu.memory_space<vmem>>, vector<8x8xf32>
    %c0_1 = arith.constant 0 : index
    %c0_2 = arith.constant 0 : index
    %1 = vector.load %arg2[%c0_1, %c0_2] : memref<288x128xf32, #tpu.memory_space<vmem>>, vector<8x128xf32>
    %c8 = arith.constant 8 : index
    %c0_3 = arith.constant 0 : index
    %2 = vector.load %arg2[%c8, %c0_3] : memref<288x128xf32, #tpu.memory_space<vmem>>, vector<128x128xf32>
    %c136 = arith.constant 136 : index
    %c0_4 = arith.constant 0 : index
    %3 = vector.load %arg2[%c136, %c0_4] : memref<288x128xf32, #tpu.memory_space<vmem>>, vector<128x128xf32>
    %c264 = arith.constant 264 : index
    %c0_5 = arith.constant 0 : index
    %4 = vector.load %arg2[%c264, %c0_5] : memref<288x128xf32, #tpu.memory_space<vmem>>, vector<1x128xf32>
    %c272 = arith.constant 272 : index
    %c0_6 = arith.constant 0 : index
    %5 = vector.load %arg2[%c272, %c0_6] : memref<288x128xf32, #tpu.memory_space<vmem>>, vector<1x128xf32>
    %c280 = arith.constant 280 : index
    %c0_7 = arith.constant 0 : index
    %6 = vector.load %arg2[%c280, %c0_7] : memref<288x128xf32, #tpu.memory_space<vmem>>, vector<1x128xf32>
    %cst = arith.constant dense<0.000000e+00> : vector<8x128xf32>
    %7 = tpu.matmul %0, %1, %cst {dimension_numbers = #tpu.dot_dimension_numbers<[1], [0], [0], [1], [0, 0, 1, 1], [], []>} : vector<8x8xf32>, vector<8x128xf32>, vector<8x128xf32> -> vector<8x128xf32>
    %8 = vector.broadcast %4 : vector<1x128xf32> to vector<8x128xf32>
    %9 = arith.addf %7, %8 : vector<8x128xf32>
    %10 = math.tanh %9 : vector<8x128xf32>
    %cst_8 = arith.constant dense<0.000000e+00> : vector<8x128xf32>
    %11 = tpu.matmul %10, %2, %cst_8 {dimension_numbers = #tpu.dot_dimension_numbers<[1], [0], [0], [1], [0, 0, 1, 1], [], []>} : vector<8x128xf32>, vector<128x128xf32>, vector<8x128xf32> -> vector<8x128xf32>
    %12 = vector.broadcast %5 : vector<1x128xf32> to vector<8x128xf32>
    %13 = arith.addf %11, %12 : vector<8x128xf32>
    %14 = math.tanh %13 : vector<8x128xf32>
    %cst_9 = arith.constant dense<0.000000e+00> : vector<8x128xf32>
    %15 = tpu.matmul %14, %3, %cst_9 {dimension_numbers = #tpu.dot_dimension_numbers<[1], [0], [0], [1], [0, 0, 1, 1], [], []>} : vector<8x128xf32>, vector<128x128xf32>, vector<8x128xf32> -> vector<8x128xf32>
    %16 = vector.broadcast %6 : vector<1x128xf32> to vector<8x128xf32>
    %17 = arith.addf %15, %16 : vector<8x128xf32>
    %c0_10 = arith.constant 0 : index
    %c0_11 = arith.constant 0 : index
    %18 = vector.load %arg3[%c0_10, %c0_11] : memref<8x128xf32, #tpu.memory_space<vmem>>, vector<8x128xf32>
    tpu.vector_store %arg3[%c0_10, %c0_11], %17 {strides = array<i32>} : memref<8x128xf32, #tpu.memory_space<vmem>>, vector<8x128xf32>,
    return
  }
  func.func @transform_0(%arg0: i32) -> (i32, i32) {
    %c0_i32 = arith.constant 0 : i32
    %c0_i32_0 = arith.constant 0 : i32
    return %arg0, %c0_i32 : i32, i32
  }
  func.func @transform_1(%arg0: i32) -> (i32, i32) {
    %c0_i32 = arith.constant 0 : i32
    %c0_i32_0 = arith.constant 0 : i32
    %c0_i32_1 = arith.constant 0 : i32
    return %c0_i32, %c0_i32_0 : i32, i32
  }
  func.func @transform_2(%arg0: i32) -> (i32, i32) {
    %c0_i32 = arith.constant 0 : i32
    %c0_i32_0 = arith.constant 0 : i32
    return %arg0, %c0_i32 : i32, i32
  }
}

</mosaic_0001>

<bundles_post_ra>
// kernel: critic_forward.1
= control target key start
LH: loop header
LB: loop body
LE: loop exit
PB: predicated region body
PF: predicated region fallthrough
CT: control target
= control target key end

     0   :  { %7 = vsyncpa [#allocation3], 0  ;;  %s176_s12 = smov [#allocation2]   ;;  %s177_s14 = smov 128   ;;  %s203_s0 = inlined_call_operand.vmem [shape: f32[8,8], index: 0, kind: input, shape index: {}]   ;;  %s204_s1 = inlined_call_operand.hbm [shape: f32[288,128], index: 1, kind: input, shape index: {}]   ;;  %s205_s2 = inlined_call_operand.vmem [shape: f32[8,128], index: 2, kind: output, shape index: {}]  }
   0x1   :  { %s14_s11 = sshll.u32 %s204_s1, 4  ;;  %s16_s13 = sshll.u32 %s176_s12, 4  ;;  %s15_s11 = int_to_ptr.hbm [resolvable:$true] %s14_s11  ;;  %s17_s13 = int_to_ptr.vmem [resolvable:$true] %s16_s13 }
   0x2   :  { %s178_s15 = smov 8  }
   0x3   :  { %22 = dma.hbm_to_vmem [thread:$0]  %s15_s11, 4608, %s17_s13, [#allocation3], %s177_s14, %s177_s14, %s178_s15  }
   0x4   :  { %174 = dma.done.wait [#allocation3], 4608  }
   0x5   :  { %175 = vsyncadd [#allocation3], 4294962688  ;;  %vm65_vm0 = vcmask 64512   ;;  %v28_v0 = vld [vmem:[#allocation2] sm:$0xff]  ;;  %v43_v3 = vld [vmem:[#allocation2 + $0x78] sm:$0xff] }
   0x6   :  { %v27_v1 = vld [vmem:[%s203_s0] sm:$0xff]  ;;  %84 = vmatpush.msra.mxu0 %v28_v0  ;;  %v42_v4 = vld [vmem:[#allocation2 + $0x70] sm:$0xff]  ;;  %v41_v5 = vld [vmem:[#allocation2 + $0x68] sm:$0xff] }
   0x7   :  { %v44_v2 = vld [vmem:[#allocation2 + $0x80] sm:$0xff]  ;;  %139 = vmatmul.msk.f32.vlgmr.msra.gmra.mxu0 %vm65_vm0, %v27_v1  ;;  %v39_v7 = vld [vmem:[#allocation2 + $0x58] sm:$0xff]  ;;  %v38_v8 = vld [vmem:[#allocation2 + $0x50] sm:$0xff] }
   0x8   :  { %91 = vmatpush.msra.mxu1 %v44_v2  ;;  %v40_v6 = vld [vmem:[#allocation2 + $0x60] sm:$0xff]  ;;  %v37_v9 = vld [vmem:[#allocation2 + $0x48] sm:$0xff]  ;;  %v35_v11 = vld [vmem:[#allocation2 + $0x38] sm:$0xff] }
   0x9   :  { %v36_v10 = vld [vmem:[#allocation2 + $0x40] sm:$0xff]  ;;  %v34_v12 = vld [vmem:[#allocation2 + $0x30] sm:$0xff]  ;;  %v33_v13 = vld [vmem:[#allocation2 + $0x28] sm:$0xff] }
   0xa   :  { %92 = vmatpush.msra.mxu1 %v43_v3  ;;  %v32_v14 = vld [vmem:[#allocation2 + $0x20] sm:$0xff]  ;;  %v31_v15 = vld [vmem:[#allocation2 + $0x18] sm:$0xff]  ;;  %v30_v16 = vld [vmem:[#allocation2 + $0x10] sm:$0xff] }
   0xb   :  { %v29_v17 = vld [vmem:[#allocation2 + $0x8] sm:$0xff]  ;;  %v60_v18 = vld [vmem:[#allocation2 + $0x100] sm:$0xff]  ;;  %v59_v19 = vld [vmem:[#allocation2 + $0xf8] sm:$0xff] }
   0xc   :  { %93 = vmatpush.msra.mxu1 %v42_v4  ;;  %113 = vmatpush.msra.mxu2 %v60_v18  ;;  %v58_v20 = vld [vmem:[#allocation2 + $0xf0] sm:$0xff]  ;;  %v57_v21 = vld [vmem:[#allocation2 + $0xe8] sm:$0xff]  ;;  %v56_v22 = vld [vmem:[#allocation2 + $0xe0] sm:$0xff] }
   0xd   :  { %v55_v23 = vld [vmem:[#allocation2 + $0xd8] sm:$0xff]  ;;  %v54_v24 = vld [vmem:[#allocation2 + $0xd0] sm:$0xff]  ;;  %v53_v25 = vld [vmem:[#allocation2 + $0xc8] sm:$0xff] }
   0xe   :  { %94 = vmatpush.msra.mxu1 %v41_v5  ;;  %114 = vmatpush.msra.mxu2 %v59_v19  ;;  %v52_v26 = vld [vmem:[#allocation2 + $0xc0] sm:$0xff]  ;;  %v51_v27 = vld [vmem:[#allocation2 + $0xb8] sm:$0xff]  ;;  %v50_v28 = vld [vmem:[#allocation2 + $0xb0] sm:$0xff] }
   0xf   :  { %v143_v29 = vld [vmem:[#allocation2 + $0x108] ss:$0 sm:$0xff]  ;;  %v48_v34 = vld [vmem:[#allocation2 + $0xa0] sm:$0xff]  ;;  %v47_v35 = vld [vmem:[#allocation2 + $0x98] sm:$0xff] }
  0x10   :  { %95 = vmatpush.msra.mxu1 %v40_v6  ;;  %115 = vmatpush.msra.mxu2 %v58_v20  ;;  %v49_v33 = vld [vmem:[#allocation2 + $0xa8] sm:$0xff]  ;;  %v46_v36 = vld [vmem:[#allocation2 + $0x90] sm:$0xff]  ;;  %v145_v42 = vld [vmem:[#allocation2 + $0x118] ss:$0 sm:$0xff] }
  0x11   :  { %v45_v37 = vld [vmem:[#allocation2 + $0x88] sm:$0xff]  ;;  %v144_v38 = vld [vmem:[#allocation2 + $0x110] ss:$0 sm:$0xff] }
  0x12   :  { %96 = vmatpush.msra.mxu1 %v39_v7  ;;  %116 = vmatpush.msra.mxu2 %v57_v21 }
  0x14   :  { %97 = vmatpush.msra.mxu1 %v38_v8  ;;  %117 = vmatpush.msra.mxu2 %v56_v22 }
  0x16   :  { %98 = vmatpush.msra.mxu1 %v37_v9  ;;  %118 = vmatpush.msra.mxu2 %v55_v23 }
  0x18   :  { %99 = vmatpush.msra.mxu1 %v36_v10  ;;  %119 = vmatpush.msra.mxu2 %v54_v24 }
  0x1a   :  { %100 = vmatpush.msra.mxu1 %v35_v11  ;;  %120 = vmatpush.msra.mxu2 %v53_v25 }
  0x1c   :  { %101 = vmatpush.msra.mxu1 %v34_v12  ;;  %121 = vmatpush.msra.mxu2 %v52_v26 }
  0x1e   :  { %102 = vmatpush.msra.mxu1 %v33_v13  ;;  %122 = vmatpush.msra.mxu2 %v51_v27 }
  0x20   :  { %103 = vmatpush.msra.mxu1 %v32_v14  ;;  %123 = vmatpush.msra.mxu2 %v50_v28 }
  0x22   :  { %104 = vmatpush.msra.mxu1 %v31_v15  ;;  %124 = vmatpush.msra.mxu2 %v49_v33 }
  0x24   :  { %105 = vmatpush.msra.mxu1 %v30_v16  ;;  %125 = vmatpush.msra.mxu2 %v48_v34 }
  0x26   :  { %106 = vmatpush.msra.mxu1 %v29_v17  ;;  %126 = vmatpush.msra.mxu2 %v47_v35 }
  0x28   :  { %127 = vmatpush.msra.mxu2 %v46_v36 }
  0x2a   :  { %128 = vmatpush.msra.mxu2 %v45_v37 }
  0x84   :  { %v86_v30 = vpop.f32.mrf.mxu0 }
  0x85   :  { %v87_v31 = vadd.f32 %v143_v29, %v86_v30 }
  0x87   :  { %146 = vtanh.f32 %v87_v31 }
  0x8d   :  { %v147_v32 = vpop.eup %146 }
  0x8e   :  { %107 = vmatmul.f32.vlgmr.msra.gmra.mxu1 %v147_v32 }
 0x10b   :  { %v108_v39 = vpop.f32.mrf.mxu1 }
 0x10c   :  { %v109_v40 = vadd.f32 %v144_v38, %v108_v39 }
 0x10e   :  { %148 = vtanh.f32 %v109_v40 }
 0x114   :  { %v149_v41 = vpop.eup %148 }
 0x115   :  { %129 = vmatmul.f32.vlgmr.msra.gmra.mxu2 %v149_v41 }
 0x198   :  { %v130_v43 = vpop.f32.mrf.mxu2 }
 0x199   :  { %v131_v44 = vadd.f32 %v145_v42, %v130_v43 }
 0x19b   :  { %133 = vst [vmem:[%s205_s2] sm:$0xff] %v131_v44 }
 0x19c   :  { %138 = vsyncpa [#allocation3], 1 }

</bundles_post_ra>
